<compile_context>
chip_gen: v7x
topology: tpu7x:2x2x1
jax: 0.10.0
libtpu: 0.0.40
codegen_flags: <defaults>
</compile_context>

<pallas_src>
import jax
import jax.numpy as jnp
from jax.experimental import pallas as pl
from jax.experimental.pallas import tpu as pltpu

_LANES = 128
_SUBLANES = 8
_WIDE_WIDTHS = (1024, 512, 256, 128)      # preferred lane-dense slab widths
_TARGET_BLOCK_BYTES = 4 * 1024 * 1024     # ~4 MiB per buffer (perf review)
_VMEM_LIMIT_BYTES = 32 * 1024 * 1024      # room for 4 x 4 MiB double-buffered
_SMALL_N_FAST_PATH = 64 * 1024            # below this, plain XLA fma is faster


def linear1x1_kernel(w_ref, b_ref, x_ref, o_ref):
    # w_ref, b_ref: (1, 1) scalars in SMEM.
    # x_ref, o_ref: (tile_rows, width) lane-dense VMEM tiles of the flat batch.
    w = w_ref[0, 0]
    b = b_ref[0, 0]
    # Pure VPU: one multiply-add per vreg, no MXU push/pop, no transpose.
    o_ref[...] = (x_ref[...] * w + b).astype(o_ref.dtype)


def linear_forward(x, weight, bias, *,
                   min_pallas_elems=_SMALL_N_FAST_PATH,
                   block_bytes=_TARGET_BLOCK_BYTES):
    """Pallas forward for torch.nn.Linear(1, 1): y = x @ W^T + b."""
    n, in_f = x.shape
    out_f, w_in = weight.shape
    assert in_f == 1 and out_f == 1 and w_in == 1, "specialized for Linear(1, 1)"

    # ---- tiny-batch fast path (also covers n == 0) -------------------------
    if n < min_pallas_elems:
        return (x * weight.reshape(1, 1) + bias.reshape(1, 1)).astype(x.dtype)

    itemsize = jnp.dtype(x.dtype).itemsize

    # ---- lane-dense re-layout of the batch dimension -----------------------
    # Widest width dividing n -> reshape is a free bitcast, no pad / no slice.
    width = None
    for cand in _WIDE_WIDTHS:
        if n % cand == 0:
            width = cand
            break
    if width is None:                      # ragged n: pay one pad copy
        width = _WIDE_WIDTHS[0]
    n_pad = pl.cdiv(n, width) * width

    x_flat = x.reshape(-1)
    if n_pad != n:
        x_flat = jnp.pad(x_flat, (0, n_pad - n))
    rows = n_pad // width
    x_slab = x_flat.reshape(rows, width)

    # ---- tile sizing: big blocks so the stream approaches HBM roofline -----
    target_rows = max(
        _SUBLANES,
        (block_bytes // (width * itemsize)) // _SUBLANES * _SUBLANES,
    )
    if rows < _SUBLANES:
        tile_rows = rows                   # full-extent block (always legal)
    else:
        tile_rows = min(target_rows, (rows // _SUBLANES) * _SUBLANES)
    grid = (pl.cdiv(rows, tile_rows),)     # ragged last block handled by Pallas

    w2d = weight.reshape(1, 1).astype(jnp.float32)
    b2d = bias.reshape(1, 1).astype(jnp.float32)

    cost = pl.CostEstimate(
        flops=2 * n,
        transcendentals=0,
        bytes_accessed=2 * n * itemsize + 2 * 4,   # unpadded stream + scalars
    )

    y_slab = pl.pallas_call(
        linear1x1_kernel,
        out_shape=jax.ShapeDtypeStruct((rows, width), x.dtype),
        grid=grid,
        in_specs=[
            pl.BlockSpec(memory_space=pltpu.MemorySpace.SMEM),   # weight scalar
            pl.BlockSpec(memory_space=pltpu.MemorySpace.SMEM),   # bias scalar
            pl.BlockSpec((tile_rows, width), lambda i: (i, 0)),
        ],
        out_specs=pl.BlockSpec((tile_rows, width), lambda i: (i, 0)),
        compiler_params=pltpu.CompilerParams(
            # "parallel" lets v7x shard grid steps across its 2 TensorCores;
            # it is a no-op on single-TC v5e/v6e.
            dimension_semantics=("parallel",),
            vmem_limit_bytes=_VMEM_LIMIT_BYTES,
        ),
        cost_estimate=cost,
    )(w2d, b2d, x_slab)

    y_flat = y_slab.reshape(-1)
    if n_pad != n:
        y_flat = y_flat[:n]
    return y_flat.reshape(n, out_f)


if __name__ == "__main__":
    key = jax.random.PRNGKey(0)
    k_w, k_b, k_x1, k_x2 = jax.random.split(key, 4)

    in_features, out_features = 1, 1
    # torch.nn.Linear default init: U(-1/sqrt(in), 1/sqrt(in))
    bound = 1.0 / jnp.sqrt(jnp.float32(in_features))
    weight = jax.random.uniform(
        k_w, (out_features, in_features), jnp.float32, -bound, bound
    )
    bias = jax.random.uniform(k_b, (out_features,), jnp.float32, -bound, bound)

    def ref(xx):
        return xx @ weight.T + bias[None, :]

    # 1) Module's example usage: small batch including new_x = 4.0.
    #    Takes the pure-XLA fast path by default (kernel launch not worth it).
    batch = 8
    x_small = jax.random.uniform(k_x1, (batch, in_features), jnp.float32, -2.0, 2.0)
    x_small = x_small.at[0, 0].set(4.0)
    y_fast = linear_forward(x_small, weight, bias)
    jax.block_until_ready(y_fast)
    assert y_fast.shape == (batch, out_features)
    assert jnp.allclose(y_fast, ref(x_small), atol=1e-6)

    # 2) Same small batch forced through the Pallas kernel
    #    (exercises the pad branch, width=1024, single grid step).
    y_small = linear_forward(x_small, weight, bias, min_pallas_elems=0)
    jax.block_until_ready(y_small)
    assert y_small.shape == (batch, out_features)
    assert jnp.allclose(y_small, ref(x_small), atol=1e-6)

    # 3) Modest batch forced through the Pallas kernel with a tiny block size
    #    (exercises the no-pad free-bitcast branch, multiple grid steps and a
    #    ragged/masked last row-block).
    batch2 = 9 * _LANES  # 1152: multiple of 128 but not 256 -> width=128, rows=9
    x_med = jax.random.uniform(k_x2, (batch2, in_features), jnp.float32, -2.0, 2.0)
    y_med = linear_forward(
        x_med, weight, bias,
        min_pallas_elems=0,
        block_bytes=_SUBLANES * _LANES * 4,   # (8,128) f32 block -> grid of 2
    )
    jax.block_until_ready(y_med)
    assert y_med.shape == (batch2, out_features)
    assert jnp.allclose(y_med, ref(x_med), atol=1e-6)

    print("KERNEL_OK")
</pallas_src>

<mosaic_0001>
module attributes {stable_mosaic.version = 11 : i64} {
  func.func @linear1x1_kernel(%arg0: i32, %arg1: memref<1x1xf32, #tpu.memory_space<smem>>, %arg2: memref<1x1xf32, #tpu.memory_space<smem>>, %arg3: memref<1x1024xf32, #tpu.memory_space<vmem>>, %arg4: memref<1x1024xf32, #tpu.memory_space<vmem>>) attributes {dimension_semantics = [#tpu.dimension_semantics<parallel>], iteration_bounds = array<i64: 1>, scalar_prefetch = 0 : i64, scratch_operands = 0 : i64, tpu.core_type = #tpu.core_type<tc>, window_params = [{transform_indices = @transform_0, window_bounds = array<i64: 1, 1>}, {transform_indices = @transform_1, window_bounds = array<i64: 1, 1>}, {transform_indices = @transform_2, window_bounds = array<i64: 1, 1024>}, {transform_indices = @transform_3, window_bounds = array<i64: 1, 1024>}]} {
    %c0 = arith.constant 0 : index
    %c0_0 = arith.constant 0 : index
    %0 = memref.load %arg1[%c0, %c0_0] : memref<1x1xf32, #tpu.memory_space<smem>>
    %c0_1 = arith.constant 0 : index
    %c0_2 = arith.constant 0 : index
    %1 = memref.load %arg2[%c0_1, %c0_2] : memref<1x1xf32, #tpu.memory_space<smem>>
    %c0_3 = arith.constant 0 : index
    %c0_4 = arith.constant 0 : index
    %2 = vector.load %arg3[%c0_3, %c0_4] : memref<1x1024xf32, #tpu.memory_space<vmem>>, vector<1x1024xf32>
    %3 = vector.broadcast %0 : f32 to vector<1x1024xf32>
    %4 = arith.mulf %2, %3 : vector<1x1024xf32>
    %5 = vector.broadcast %1 : f32 to vector<1x1024xf32>
    %6 = arith.addf %4, %5 : vector<1x1024xf32>
    %c0_5 = arith.constant 0 : index
    %c0_6 = arith.constant 0 : index
    %7 = vector.load %arg4[%c0_5, %c0_6] : memref<1x1024xf32, #tpu.memory_space<vmem>>, vector<1x1024xf32>
    tpu.vector_store %arg4[%c0_5, %c0_6], %6 {strides = array<i32>} : memref<1x1024xf32, #tpu.memory_space<vmem>>, vector<1x1024xf32>,
    return
  }
  func.func @transform_0(%arg0: i32) -> (i32, i32) {
    %c0_i32 = arith.constant 0 : i32
    %c0_i32_0 = arith.constant 0 : i32
    %c0_i32_1 = arith.constant 0 : i32
    return %c0_i32, %c0_i32_0 : i32, i32
  }
  func.func @transform_1(%arg0: i32) -> (i32, i32) {
    %c0_i32 = arith.constant 0 : i32
    %c0_i32_0 = arith.constant 0 : i32
    %c0_i32_1 = arith.constant 0 : i32
    return %c0_i32, %c0_i32_0 : i32, i32
  }
  func.func @transform_2(%arg0: i32) -> (i32, i32) {
    %c0_i32 = arith.constant 0 : i32
    %c0_i32_0 = arith.constant 0 : i32
    return %arg0, %c0_i32 : i32, i32
  }
  func.func @transform_3(%arg0: i32) -> (i32, i32) {
    %c0_i32 = arith.constant 0 : i32
    %c0_i32_0 = arith.constant 0 : i32
    return %arg0, %c0_i32 : i32, i32
  }
}

</mosaic_0001>

<bundles_post_ra>
// kernel: tpu_custom_call.1
= control target key start
LH: loop header
LB: loop body
LE: loop exit
PB: predicated region body
PF: predicated region fallthrough
CT: control target
= control target key end

     0   :  { %10 = vsyncpa [#allocation5], 0  ;;  %s154_s0 = inlined_call_operand.<no memory space> [shape: f32[1,1], index: 0, kind: input, shape index: {}]   ;;  %s155_s1 = inlined_call_operand.<no memory space> [shape: f32[1,1], index: 1, kind: input, shape index: {}]   ;;  %s156_s2 = inlined_call_operand.hbm [shape: f32[1,1024], index: 2, kind: input, shape index: {}]   ;;  %s157_s3 = inlined_call_operand.hbm [shape: f32[1,1024], index: 3, kind: output, shape index: {}]  }
   0x1   :  { %11 = vsyncpa [#allocation6], 0  ;;  %s102_s12 = smov [#allocation4]   ;;  %s54_s16 = scalar_lea.hbm %s156_s2, 128 }
   0x2   :  { %s22_s13 = sshll.u32 %s102_s12, 4  ;;  %p55_p0 = scmp.ne.s32.totalorder %s156_s2, %s54_s16  ;;  %s23_s13 = int_to_ptr.vmem [resolvable:$true] %s22_s13 }
   0x3   :  { %p58_p1 = scmp.lt.u32.totalorder %s54_s16, %s156_s2 }
   0x5   :  { %p60_p2 = pnand %p58_p1, %p55_p0 }
   0x7   :  { %63 = shalt.err (!%p60_p2)
}
   0x8   :  { %s64_s21 = scalar_lea.vmem %s23_s13, 128  ;;  %p69_p4 = scmp.lt.s32.totalorder %s23_s13, %s23_s13 }
   0x9   :  { %p65_p3 = scmp.ne.s32.totalorder %s23_s13, %s64_s21  ;;  %p70_p5 = scmp.lt.s32.totalorder %s64_s21, %s64_s21 }
   0xb   :  { %p71_p6 = por %p70_p5, %p69_p4 }
   0xd   :  { %p72_p7 = pnand %p71_p6, %p65_p3 }
   0xf   :  { %75 = shalt.err (!%p72_p7)
}
  0x10   :  { %25 = dma.hbm_to_vmem [thread:$0]  %s156_s2, 128, %s23_s13, [#allocation5]  }
  0x11   :  { %98 = dma.done.wait [#allocation5], 128  }
  0x12   :  { %99 = vsyncadd [#allocation5], 4294967168  ;;  %v32_v0 = vstv %s154_s0  ;;  %v31_v1 = vld [vmem:[#allocation4] sm:$0xff]  ;;  %v34_v2 = vstv %s155_s1  ;;  %s103_s28 = smov [#allocation7]  }
  0x13   :  { %s43_s29 = sshll.u32 %s103_s28, 4  ;;  %v33_v3 = vmul.f32 %v32_v0, %v31_v1  ;;  %s44_s29 = int_to_ptr.vmem [resolvable:$true] %s43_s29 }
  0x14   :  { %s76_s30 = scalar_lea.vmem %s44_s29, 128  ;;  %p81_p9 = scmp.lt.s32.totalorder %s44_s29, %s44_s29 }
  0x15   :  { %v35_v4 = vadd.f32 %v34_v2, %v33_v3  ;;  %p77_p8 = scmp.ne.s32.totalorder %s44_s29, %s76_s30  ;;  %p82_p10 = scmp.lt.s32.totalorder %s76_s30, %s76_s30 }
  0x17   :  { %36 = vst [vmem:[#allocation7] sm:$0xff] %v35_v4  ;;  %p83_p11 = por %p82_p10, %p81_p9 }
  0x19   :  { %p84_p12 = pnand %p83_p11, %p77_p8 }
  0x1b   :  { %87 = shalt.err (!%p84_p12)
}
  0x1c   :  { %s88_s4 = scalar_lea.hbm %s157_s3, 128 }
  0x1d   :  { %p89_p13 = scmp.ne.s32.totalorder %s157_s3, %s88_s4  ;;  %p92_p0 = scmp.lt.u32.totalorder %s88_s4, %s157_s3 }
  0x1f   :  { %p94_p1 = pnand %p92_p0, %p89_p13 }
  0x21   :  { %97 = shalt.err (!%p94_p1)
}
  0x22   :  { %46 = dma.vmem_to_hbm [thread:$0]  %s44_s29, 128, %s157_s3, [#allocation6]  }
  0x23   :  { %100 = dma.done.wait [#allocation6], 128  }
  0x24   :  { %101 = vsyncadd [#allocation6], 4294967168 }
  0x25   :  { %50 = vsyncpa [#allocation5], 1 }
  0x26   :  { %51 = vsyncpa [#allocation6], 1 }

</bundles_post_ra>
